<compile_context>
chip_gen: v7x
topology: tpu7x:2x2x1
jax: 0.10.0
libtpu: 0.0.40
codegen_flags: <defaults>
</compile_context>

<pallas_src>
import functools

import jax
import jax.numpy as jnp
from jax import lax
from jax.experimental import pallas as pl
from jax.experimental.pallas import tpu as pltpu


# ----------------------------------------------------------------------------
# Lane-group helpers.
#
# Arrays are laid out [B (sublanes = target row r), B*D (lanes = c*D + i)]:
# for each target row r the B candidate rows c are packed along lanes in
# groups of width D.  All shifts below are multiples of D, so a cyclic lane
# roll only ever combines entries that share the same feature index i.
# ----------------------------------------------------------------------------
def _group_sum(v, batch, width):
    """Exact sum over the `batch` lane-groups of width `width`; the result is
    replicated into every group."""
    if batch & (batch - 1) == 0:          # power of two: log2(B) doubling steps
        s = width
        while s < batch * width:
            v = v + pltpu.roll(v, s, axis=1)
            s *= 2
        return v
    acc = v                               # general B: B-1 rolls of the original
    for c in range(1, batch):
        acc = acc + pltpu.roll(v, c * width, axis=1)
    return acc


def _group_max(v, batch, width):
    s = width
    while s < batch * width:              # over-coverage is fine (idempotent)
        v = jnp.maximum(v, pltpu.roll(v, s, axis=1))
        s *= 2
    return v


def _group_min(v, batch, width):
    s = width
    while s < batch * width:
        v = jnp.minimum(v, pltpu.roll(v, s, axis=1))
        s *= 2
    return v


def _prlayer_kernel(xf_ref, w_ref, b_ref, out_ref, *, num_neigh, batch, in_dim):
    B, D = batch, in_dim
    BD = B * D
    k = num_neigh
    m = B - k                                  # candidates NOT averaged per (r, i)
    inv_k = jnp.float32(1.0 / k)

    # xf[0, c*D + i] = x[c, i]   (free row-major reshape done in the wrapper)
    xf = xf_ref[...]
    cand = jnp.broadcast_to(xf, (B, BD))       # cand[r, c*D+i] = x[c, i]

    lane = lax.broadcasted_iota(jnp.int32, (B, BD), 1)
    row = lax.broadcasted_iota(jnp.int32, (B, BD), 0)
    row_start = row * D
    diag_mask = (lane >= row_start) & (lane < row_start + D)   # lane group == r

    # self_rep[r, c*D+i] = x[r, i]: keep row r's own group, replicate it across
    # all groups with lane rolls (no sublane<->lane relayout anywhere).
    self_rep = _group_sum(jnp.where(diag_mask, cand, 0.0), B, D)

    diff = cand - self_rep                     # diff[r, c*D+i] = x[c,i] - x[r,i]
    dist = jnp.abs(diff)
    xs = self_rep[:, :D]                       # [B, D] == x (offset-0 lane slice)

    if m == 0:
        # Every row is a neighbour of every row: plain column mean.
        t = _group_sum(cand, B, D)[:, :D] * inv_k
    elif m <= k:
        # Complement selection: drop the m farthest candidates (distance ties
        # drop the larger row index first), leaving exactly the first k entries
        # of a stable ascending argsort.  Difference space keeps the summed
        # terms small:  t = x[r,i] + mean(kept diffs).
        sum_all = _group_sum(diff, B, D)[:, :D]            # [B, D]
        excl = jnp.zeros((B, BD), jnp.float32)
        d = dist
        for _ in range(m):
            dmax = _group_max(d, B, D)
            at_max = d == dmax
            pick = _group_max(jnp.where(at_max, lane, -1), B, D)   # larger c wins tie
            chosen = at_max & (lane == pick)
            excl = excl + jnp.where(chosen, diff, 0.0)
            d = jnp.where(chosen, jnp.float32(-1.0), d)    # dist >= 0: never re-picked
        t = xs + (sum_all - _group_sum(excl, B, D)[:, :D]) * inv_k
    else:
        # Direct selection of the k nearest (ties -> smaller row index first).
        kept = jnp.zeros((B, BD), jnp.float32)
        taken = jnp.zeros((B, BD), jnp.bool_)
        d = dist
        for _ in range(k):
            d_eff = jnp.where(taken, jnp.float32(jnp.inf), d)
            dmin = _group_min(d_eff, B, D)
            at_min = (d_eff == dmin) & jnp.logical_not(taken)
            pick = _group_min(jnp.where(at_min, lane, BD), B, D)   # smaller c wins tie
            chosen = at_min & (lane == pick)
            kept = kept + jnp.where(chosen, diff, 0.0)
            taken = taken | chosen
        t = xs + _group_sum(kept, B, D)[:, :D] * inv_k

    # Linear layer: weight kept in PyTorch [out_dim, in_dim] layout; contract
    # dim 1 of both operands so the MXU consumes the transposed RHS directly.
    out = lax.dot_general(t, w_ref[...],
                          dimension_numbers=(((1,), (1,)), ((), ())),
                          preferred_element_type=jnp.float32)
    out_ref[...] = (out + b_ref[...]).astype(out_ref.dtype)


@functools.partial(jax.jit, static_argnames=("num_neigh",))
def prlayer_forward(x, w, b, *, num_neigh):
    """PRLayer.forward for a single batch.

    x: [B, in_dim] f32, w: [out_dim, in_dim] f32 (PyTorch nn.Linear layout),
    b: [out_dim] f32.
    """
    B, D = x.shape
    out_dim = w.shape[0]
    if B < num_neigh:
        raise ValueError("batch size must be >= num_neigh")

    kernel = functools.partial(_prlayer_kernel, num_neigh=num_neigh,
                               batch=B, in_dim=D)
    vmem = pl.BlockSpec(memory_space=pltpu.MemorySpace.VMEM)
    # x.reshape / b.reshape are contiguous metadata-only reshapes (unlike the
    # removed per-call `w.T`).
    return pl.pallas_call(
        kernel,
        out_shape=jax.ShapeDtypeStruct((B, out_dim), jnp.float32),
        in_specs=[vmem, vmem, vmem],
        out_specs=vmem,
    )(x.reshape(1, B * D), w, b.reshape(1, out_dim))


@functools.partial(jax.jit, static_argnames=("num_neigh",))
def prlayer_forward_grouped(xg, w, b, *, num_neigh):
    """PRLayer.forward applied independently to G groups: xg [G, B, in_dim].

    One grid step per group, marked "parallel" so both v7x TensorCores get
    work; on v5e/v6e it amortizes dispatch/DMA setup across groups.
    """
    G, B, D = xg.shape
    out_dim = w.shape[0]
    if B < num_neigh:
        raise ValueError("batch size must be >= num_neigh")

    kernel = functools.partial(_prlayer_kernel, num_neigh=num_neigh,
                               batch=B, in_dim=D)
    return pl.pallas_call(
        kernel,
        out_shape=jax.ShapeDtypeStruct((G, B, out_dim), jnp.float32),
        grid=(G,),
        in_specs=[
            pl.BlockSpec((None, 1, B * D), lambda g: (g, 0, 0)),
            pl.BlockSpec((out_dim, D), lambda g: (0, 0)),
            pl.BlockSpec((1, out_dim), lambda g: (0, 0)),
        ],
        out_specs=pl.BlockSpec((None, B, out_dim), lambda g: (g, 0, 0)),
        compiler_params=pltpu.CompilerParams(
            dimension_semantics=("parallel",)),
    )(xg.reshape(G, 1, B * D), w, b.reshape(1, out_dim))


def _prlayer_reference(x, w, b, num_neigh):
    """Pure-JAX reference of PRLayer.forward (stable argsort, ties -> lower index)."""
    B, D = x.shape
    dist = jnp.abs(x[None, :, :] - x[:, None, :])            # [B, B, D]
    idx = jnp.argsort(dist, axis=1)[:, :num_neigh, :]        # stable by default
    x_b = jnp.broadcast_to(x[None, :, :], (B, B, D))
    sel = jnp.take_along_axis(x_b, idx, axis=1)              # [B, k, D]
    t = jnp.sum(sel, axis=1) / num_neigh
    return t @ w.T + b


if __name__ == "__main__":
    key = jax.random.PRNGKey(0)
    B, IN_DIM, OUT_DIM, NUM_NEIGH = 8, 32, 16, 6             # batch >= num_neigh

    k_x, k_w, k_b, k_g = jax.random.split(key, 4)
    x = jax.random.normal(k_x, (B, IN_DIM), jnp.float32)
    bound = 1.0 / (IN_DIM ** 0.5)                            # nn.Linear default init range
    w = jax.random.uniform(k_w, (OUT_DIM, IN_DIM), jnp.float32, -bound, bound)
    b = jax.random.uniform(k_b, (OUT_DIM,), jnp.float32, -bound, bound)

    # Single group (the module's forward).
    out = prlayer_forward(x, w, b, num_neigh=NUM_NEIGH)
    jax.block_until_ready(out)
    assert out.shape == (B, OUT_DIM)
    ref = _prlayer_reference(x, w, b, NUM_NEIGH)
    err = float(jnp.max(jnp.abs(out - ref)))
    # Loose tolerance only because the in-kernel and reference matmuls may use
    # different MXU decompositions at default f32 precision.
    assert jnp.allclose(out, ref, rtol=1e-2, atol=1e-2), f"max abs err {err}"

    # Grouped path (keeps both v7x TensorCores busy when several independent
    # batches go through the layer at once).
    G = 4
    xg = jax.random.normal(k_g, (G, B, IN_DIM), jnp.float32)
    outg = prlayer_forward_grouped(xg, w, b, num_neigh=NUM_NEIGH)
    jax.block_until_ready(outg)
    assert outg.shape == (G, B, OUT_DIM)
    refg = jax.vmap(lambda xi: _prlayer_reference(xi, w, b, NUM_NEIGH))(xg)
    errg = float(jnp.max(jnp.abs(outg - refg)))
    assert jnp.allclose(outg, refg, rtol=1e-2, atol=1e-2), f"max abs err {errg}"

    print("KERNEL_OK")
</pallas_src>

<mosaic_0001>
module attributes {stable_mosaic.version = 11 : i64} {
  func.func @_prlayer_kernel(%arg0: memref<1x256xf32, #tpu.memory_space<vmem>>, %arg1: memref<16x32xf32, #tpu.memory_space<vmem>>, %arg2: memref<1x16xf32, #tpu.memory_space<vmem>>, %arg3: memref<8x16xf32, #tpu.memory_space<vmem>>) attributes {dimension_semantics = [], scalar_prefetch = 0 : i64, scratch_operands = 0 : i64, tpu.core_type = #tpu.core_type<tc>} {
    %c0 = arith.constant 0 : index
    %c0_0 = arith.constant 0 : index
    %0 = vector.load %arg0[%c0, %c0_0] : memref<1x256xf32, #tpu.memory_space<vmem>>, vector<1x256xf32>
    %1 = vector.shape_cast %0 : vector<1x256xf32> to vector<1x256xf32>
    %2 = vector.broadcast %1 : vector<1x256xf32> to vector<8x256xf32>
    %3 = tpu.iota {dimensions = array<i32: 1>} : vector<8x256xi32>
    %4 = tpu.iota {dimensions = array<i32: 0>} : vector<8x256xi32>
    %c32_i32 = arith.constant 32 : i32
    %5 = vector.broadcast %c32_i32 : i32 to vector<8x256xi32>
    %6 = arith.muli %4, %5 : vector<8x256xi32>
    %7 = arith.cmpi sge, %3, %6 : vector<8x256xi32>
    %c32_i32_1 = arith.constant 32 : i32
    %8 = vector.broadcast %c32_i32_1 : i32 to vector<8x256xi32>
    %9 = arith.addi %6, %8 : vector<8x256xi32>
    %10 = arith.cmpi slt, %3, %9 : vector<8x256xi32>
    %11 = arith.andi %7, %10 : vector<8x256xi1>
    %cst = arith.constant 0.000000e+00 : f32
    %12 = vector.broadcast %cst : f32 to vector<8x256xf32>
    %13 = arith.select %11, %2, %12 : vector<8x256xi1>, vector<8x256xf32>
    %c32_i32_2 = arith.constant 32 : i32
    %14 = tpu.dynamic_rotate %13 by %c32_i32_2 dim 1 : vector<8x256xf32>, i32 -> vector<8x256xf32>
    %15 = arith.addf %13, %14 : vector<8x256xf32>
    %c64_i32 = arith.constant 64 : i32
    %16 = tpu.dynamic_rotate %15 by %c64_i32 dim 1 : vector<8x256xf32>, i32 -> vector<8x256xf32>
    %17 = arith.addf %15, %16 : vector<8x256xf32>
    %c128_i32 = arith.constant 128 : i32
    %18 = tpu.dynamic_rotate %17 by %c128_i32 dim 1 : vector<8x256xf32>, i32 -> vector<8x256xf32>
    %19 = arith.addf %17, %18 : vector<8x256xf32>
    %20 = arith.subf %2, %19 : vector<8x256xf32>
    %21 = math.absf %20 : vector<8x256xf32>
    %22 = vector.extract_strided_slice %19 {offsets = [0, 0], sizes = [8, 32], strides = [1, 1]} : vector<8x256xf32> to vector<8x32xf32>
    %c32_i32_3 = arith.constant 32 : i32
    %23 = tpu.dynamic_rotate %20 by %c32_i32_3 dim 1 : vector<8x256xf32>, i32 -> vector<8x256xf32>
    %24 = arith.addf %20, %23 : vector<8x256xf32>
    %c64_i32_4 = arith.constant 64 : i32
    %25 = tpu.dynamic_rotate %24 by %c64_i32_4 dim 1 : vector<8x256xf32>, i32 -> vector<8x256xf32>
    %26 = arith.addf %24, %25 : vector<8x256xf32>
    %c128_i32_5 = arith.constant 128 : i32
    %27 = tpu.dynamic_rotate %26 by %c128_i32_5 dim 1 : vector<8x256xf32>, i32 -> vector<8x256xf32>
    %28 = arith.addf %26, %27 : vector<8x256xf32>
    %29 = vector.extract_strided_slice %28 {offsets = [0, 0], sizes = [8, 32], strides = [1, 1]} : vector<8x256xf32> to vector<8x32xf32>
    %cst_6 = arith.constant 0.000000e+00 : f32
    %30 = vector.broadcast %cst_6 : f32 to vector<8x256xf32>
    %c32_i32_7 = arith.constant 32 : i32
    %31 = tpu.dynamic_rotate %21 by %c32_i32_7 dim 1 : vector<8x256xf32>, i32 -> vector<8x256xf32>
    %32 = arith.maximumf %21, %31 : vector<8x256xf32>
    %c64_i32_8 = arith.constant 64 : i32
    %33 = tpu.dynamic_rotate %32 by %c64_i32_8 dim 1 : vector<8x256xf32>, i32 -> vector<8x256xf32>
    %34 = arith.maximumf %32, %33 : vector<8x256xf32>
    %c128_i32_9 = arith.constant 128 : i32
    %35 = tpu.dynamic_rotate %34 by %c128_i32_9 dim 1 : vector<8x256xf32>, i32 -> vector<8x256xf32>
    %36 = arith.maximumf %34, %35 : vector<8x256xf32>
    %37 = arith.cmpf oeq, %21, %36 : vector<8x256xf32>
    %c-1_i32 = arith.constant -1 : i32
    %38 = vector.broadcast %c-1_i32 : i32 to vector<8x256xi32>
    %39 = arith.select %37, %3, %38 : vector<8x256xi1>, vector<8x256xi32>
    %c32_i32_10 = arith.constant 32 : i32
    %40 = tpu.dynamic_rotate %39 by %c32_i32_10 dim 1 : vector<8x256xi32>, i32 -> vector<8x256xi32>
    %41 = arith.maxsi %39, %40 : vector<8x256xi32>
    %c64_i32_11 = arith.constant 64 : i32
    %42 = tpu.dynamic_rotate %41 by %c64_i32_11 dim 1 : vector<8x256xi32>, i32 -> vector<8x256xi32>
    %43 = arith.maxsi %41, %42 : vector<8x256xi32>
    %c128_i32_12 = arith.constant 128 : i32
    %44 = tpu.dynamic_rotate %43 by %c128_i32_12 dim 1 : vector<8x256xi32>, i32 -> vector<8x256xi32>
    %45 = arith.maxsi %43, %44 : vector<8x256xi32>
    %46 = arith.cmpi eq, %3, %45 : vector<8x256xi32>
    %47 = arith.andi %37, %46 : vector<8x256xi1>
    %cst_13 = arith.constant 0.000000e+00 : f32
    %48 = vector.broadcast %cst_13 : f32 to vector<8x256xf32>
    %49 = arith.select %47, %20, %48 : vector<8x256xi1>, vector<8x256xf32>
    %50 = arith.addf %30, %49 : vector<8x256xf32>
    %cst_14 = arith.constant -1.000000e+00 : f32
    %51 = vector.broadcast %cst_14 : f32 to vector<8x256xf32>
    %52 = arith.select %47, %51, %21 : vector<8x256xi1>, vector<8x256xf32>
    %c32_i32_15 = arith.constant 32 : i32
    %53 = tpu.dynamic_rotate %52 by %c32_i32_15 dim 1 : vector<8x256xf32>, i32 -> vector<8x256xf32>
    %54 = arith.maximumf %52, %53 : vector<8x256xf32>
    %c64_i32_16 = arith.constant 64 : i32
    %55 = tpu.dynamic_rotate %54 by %c64_i32_16 dim 1 : vector<8x256xf32>, i32 -> vector<8x256xf32>
    %56 = arith.maximumf %54, %55 : vector<8x256xf32>
    %c128_i32_17 = arith.constant 128 : i32
    %57 = tpu.dynamic_rotate %56 by %c128_i32_17 dim 1 : vector<8x256xf32>, i32 -> vector<8x256xf32>
    %58 = arith.maximumf %56, %57 : vector<8x256xf32>
    %59 = arith.cmpf oeq, %52, %58 : vector<8x256xf32>
    %c-1_i32_18 = arith.constant -1 : i32
    %60 = vector.broadcast %c-1_i32_18 : i32 to vector<8x256xi32>
    %61 = arith.select %59, %3, %60 : vector<8x256xi1>, vector<8x256xi32>
    %c32_i32_19 = arith.constant 32 : i32
    %62 = tpu.dynamic_rotate %61 by %c32_i32_19 dim 1 : vector<8x256xi32>, i32 -> vector<8x256xi32>
    %63 = arith.maxsi %61, %62 : vector<8x256xi32>
    %c64_i32_20 = arith.constant 64 : i32
    %64 = tpu.dynamic_rotate %63 by %c64_i32_20 dim 1 : vector<8x256xi32>, i32 -> vector<8x256xi32>
    %65 = arith.maxsi %63, %64 : vector<8x256xi32>
    %c128_i32_21 = arith.constant 128 : i32
    %66 = tpu.dynamic_rotate %65 by %c128_i32_21 dim 1 : vector<8x256xi32>, i32 -> vector<8x256xi32>
    %67 = arith.maxsi %65, %66 : vector<8x256xi32>
    %68 = arith.cmpi eq, %3, %67 : vector<8x256xi32>
    %69 = arith.andi %59, %68 : vector<8x256xi1>
    %cst_22 = arith.constant 0.000000e+00 : f32
    %70 = vector.broadcast %cst_22 : f32 to vector<8x256xf32>
    %71 = arith.select %69, %20, %70 : vector<8x256xi1>, vector<8x256xf32>
    %72 = arith.addf %50, %71 : vector<8x256xf32>
    %c32_i32_23 = arith.constant 32 : i32
    %73 = tpu.dynamic_rotate %72 by %c32_i32_23 dim 1 : vector<8x256xf32>, i32 -> vector<8x256xf32>
    %74 = arith.addf %72, %73 : vector<8x256xf32>
    %c64_i32_24 = arith.constant 64 : i32
    %75 = tpu.dynamic_rotate %74 by %c64_i32_24 dim 1 : vector<8x256xf32>, i32 -> vector<8x256xf32>
    %76 = arith.addf %74, %75 : vector<8x256xf32>
    %c128_i32_25 = arith.constant 128 : i32
    %77 = tpu.dynamic_rotate %76 by %c128_i32_25 dim 1 : vector<8x256xf32>, i32 -> vector<8x256xf32>
    %78 = arith.addf %76, %77 : vector<8x256xf32>
    %79 = vector.extract_strided_slice %78 {offsets = [0, 0], sizes = [8, 32], strides = [1, 1]} : vector<8x256xf32> to vector<8x32xf32>
    %80 = arith.subf %29, %79 : vector<8x32xf32>
    %cst_26 = arith.constant 0.166666672 : f32
    %81 = vector.broadcast %cst_26 : f32 to vector<8x32xf32>
    %82 = arith.mulf %80, %81 : vector<8x32xf32>
    %83 = arith.addf %22, %82 : vector<8x32xf32>
    %c0_27 = arith.constant 0 : index
    %c0_28 = arith.constant 0 : index
    %84 = vector.load %arg1[%c0_27, %c0_28] : memref<16x32xf32, #tpu.memory_space<vmem>>, vector<16x32xf32>
    %cst_29 = arith.constant dense<0.000000e+00> : vector<8x16xf32>
    %85 = tpu.matmul %83, %84, %cst_29 {dimension_numbers = #tpu.dot_dimension_numbers<[1], [1], [0], [0], [0, 0, 1, 0], [], []>} : vector<8x32xf32>, vector<16x32xf32>, vector<8x16xf32> -> vector<8x16xf32>
    %c0_30 = arith.constant 0 : index
    %c0_31 = arith.constant 0 : index
    %86 = vector.load %arg2[%c0_30, %c0_31] : memref<1x16xf32, #tpu.memory_space<vmem>>, vector<1x16xf32>
    %87 = vector.broadcast %86 : vector<1x16xf32> to vector<8x16xf32>
    %88 = arith.addf %85, %87 : vector<8x16xf32>
    %c0_32 = arith.constant 0 : index
    %c0_33 = arith.constant 0 : index
    %89 = vector.load %arg3[%c0_32, %c0_33] : memref<8x16xf32, #tpu.memory_space<vmem>>, vector<8x16xf32>
    tpu.vector_store %arg3[%c0_32, %c0_33], %88 {strides = array<i32>} : memref<8x16xf32, #tpu.memory_space<vmem>>, vector<8x16xf32>,
    return
  }
}

</mosaic_0001>

<bundles_post_ra>
// kernel: prlayer_forward.1
= control target key start
LH: loop header
LB: loop body
LE: loop exit
PB: predicated region body
PF: predicated region fallthrough
CT: control target
= control target key end

     0   :  { %v17_v0 = vlaneseq  ;;  %s558_s0 = inlined_call_operand.vmem [shape: f32[1,256], index: 0, kind: input, shape index: {}]   ;;  %s559_s1 = inlined_call_operand.vmem [shape: f32[16,32], index: 1, kind: input, shape index: {}]   ;;  %s560_s2 = inlined_call_operand.vmem [shape: f32[1,16], index: 2, kind: input, shape index: {}]   ;;  %s561_s3 = inlined_call_operand.hbm [shape: f32[8,16], index: 3, kind: output, shape index: {}]  }
   0x1   :  { %8 = vsyncpa [#allocation3], 0  ;;  %v15_v3 = vld [vmem:[%s558_s0] sm:$0x3]  ;;  %s359_s0 = smov 32   ;;  %s360_s14 = smov 64  }
   0x2   :  { %v18_v1 = vshrl.u32 %v17_v0, 7  ;;  %v385_v2 = vand.u32 127, %v17_v0  ;;  %s364_s20 = smov [#allocation2]  }
   0x3   :  { %s303_s21 = sshll.u32 %s364_s20, 4  ;;  %s304_s21 = int_to_ptr.vmem [resolvable:$true] %s303_s21 }
   0x4   :  { %v19_v4 = vsub.s32 0, %v18_v1  ;;  %v32_v5 = vmul.u32 32, %v18_v1  ;;  %v23_v6 = vsub.s32 1, %v18_v1  ;;  %v391_v7 = vadd.s32 128, %v385_v2  ;;  %s335_s22 = scalar_lea.vmem %s304_s21, 128  ;;  %p340_p1 = scmp.lt.s32.totalorder %s304_s21, %s304_s21 }
   0x5   :  { %vm46_vm6 = vcmp.lt.s32.totalorder %v385_v2, 32  ;;  %vm55_vm7 = vcmp.lt.s32.totalorder %v385_v2, 64  ;;  %p336_p0 = scmp.ne.s32.totalorder %s304_s21, %s335_s22  ;;  %p341_p2 = scmp.lt.s32.totalorder %s335_s22, %s335_s22 }
   0x6   :  { %v20_v8 = vrot.slane %v15_v3, %v19_v4  ;;  %vm33_vm0 = vcmp.ge.s32.totalorder %v385_v2, %v32_v5  ;;  %v35_v9 = vadd.s32 32, %v32_v5  ;;  %vm34_vm1 = vcmp.ge.s32.totalorder %v391_v7, %v32_v5 }
   0x7   :  { %v24_v10 = vrot.slane %v15_v3, %v23_v6  ;;  %p342_p3 = por %p341_p2, %p340_p1 }
   0x8   :  { %vm36_vm2 = vcmp.lt.s32.totalorder %v385_v2, %v35_v9  ;;  %vm37_vm3 = vcmp.lt.s32.totalorder %v391_v7, %v35_v9 }
   0x9   :  { %vm38_vm4 = vmand %vm33_vm0, %vm36_vm2  ;;  %p343_p4 = pnand %p342_p3, %p336_p0 }
   0xa   :  { %v40_v11 = vsel %vm38_vm4, %v20_v8, 0.0  ;;  %vm39_vm5 = vmand %vm34_vm1, %vm37_vm3 }
   0xb   :  { %42 = vrot.lane.b32.xlu0 %v40_v11, %s359_s0  ;;  %v41_v12 = vsel %vm39_vm5, %v24_v10, 0.0 }
   0xf   :  { %44 = vrot.lane.b32.xlu0 %v41_v12, %s359_s0 }
  0x7d   :  { %v43_v13 = vpop.permute.xlu0 %42 }
  0x81   :  { %v45_v14 = vpop.permute.xlu0 %44 }
  0x82   :  { %v48_v15 = vsel %vm46_vm6, %v45_v14, %v43_v13  ;;  %v47_v17 = vsel %vm46_vm6, %v43_v13, %v45_v14 }
  0x83   :  { %v49_v16 = vadd.f32 %v48_v15, %v40_v11  ;;  %v50_v18 = vadd.f32 %v47_v17, %v41_v12 }
  0x85   :  { %51 = vrot.lane.b32.xlu1 %v49_v16, %s360_s14 }
  0x89   :  { %53 = vrot.lane.b32.xlu1 %v50_v18, %s360_s14 }
  0xf7   :  { %v52_v19 = vpop.permute.xlu1 %51 }
  0xfb   :  { %v54_v20 = vpop.permute.xlu1 %53 }
  0xfc   :  { %v56_v21 = vsel %vm55_vm7, %v52_v19, %v54_v20  ;;  %v57_v22 = vsel %vm55_vm7, %v54_v20, %v52_v19 }
  0xfd   :  { %v58_v23 = vadd.f32 %v57_v22, %v49_v16  ;;  %v59_v24 = vadd.f32 %v56_v21, %v50_v18 }
  0xff   :  { %v411_v25 = vadd.f32 %v59_v24, %v58_v23 }
 0x101   :  { %v414_v26 = vsub.f32 %v20_v8, %v411_v25  ;;  %v417_v27 = vsub.f32 %v24_v10, %v411_v25 }
 0x103   :  { %v64_v28 = vand.u32 2147483647, %v417_v27  ;;  %v63_v29 = vand.u32 2147483647, %v414_v26 }
 0x105   :  { %84 = vrot.lane.b32.xlu1 %v64_v28, %s359_s0  ;;  %82 = vrot.lane.b32.xlu0 %v63_v29, %s359_s0 }
 0x177   :  { %v85_v30 = vpop.permute.xlu1 %84  ;;  %v83_v31 = vpop.permute.xlu0 %82 }
 0x178   :  { %v86_v32 = vsel %vm46_vm6, %v83_v31, %v85_v30  ;;  %v87_v33 = vsel %vm46_vm6, %v85_v30, %v83_v31 }
 0x179   :  { %v88_v34 = vmax.f32 %v63_v29, %v87_v33  ;;  %v89_v35 = vmax.f32 %v64_v28, %v86_v32 }
 0x17b   :  { %90 = vrot.lane.b32.xlu0 %v88_v34, %s360_s14  ;;  %92 = vrot.lane.b32.xlu1 %v89_v35, %s360_s14 }
 0x1ed   :  { %v91_v36 = vpop.permute.xlu0 %90  ;;  %v93_v37 = vpop.permute.xlu1 %92 }
 0x1ee   :  { %v94_v38 = vsel %vm55_vm7, %v91_v36, %v93_v37  ;;  %v95_v39 = vsel %vm55_vm7, %v93_v37, %v91_v36 }
 0x1ef   :  { %v96_v40 = vmax.f32 %v88_v34, %v95_v39  ;;  %v97_v41 = vmax.f32 %v89_v35, %v94_v38 }
 0x1f1   :  { %v98_v42 = vmax.f32 %v96_v40, %v97_v41 }
 0x1f3   :  { %vm100_vm8 = vcmp.eq.f32.partialorder %v64_v28, %v98_v42  ;;  %vm99_vm9 = vcmp.eq.f32.partialorder %v63_v29, %v98_v42  ;;  %v206_v42 = vld [vmem:[%s559_s1] sm:$0xff] }
 0x1f4   :  { %v102_v43 = vsel %vm100_vm8, %v391_v7, 4294967295  ;;  %v101_v44 = vsel %vm99_vm9, %v385_v2, 4294967295 }
 0x1f5   :  { %105 = vrot.lane.b32.xlu1 %v102_v43, %s359_s0  ;;  %103 = vrot.lane.b32.xlu0 %v101_v44, %s359_s0 }
 0x267   :  { %v106_v45 = vpop.permute.xlu1 %105  ;;  %v104_v46 = vpop.permute.xlu0 %103 }
 0x268   :  { %v107_v47 = vsel %vm46_vm6, %v104_v46, %v106_v45  ;;  %v108_v48 = vsel %vm46_vm6, %v106_v45, %v104_v46  ;;  %v361_v45 = vmov 0.0|0.0  }
 0x269   :  { %vm109_vm10 = vcmp.gt.s32.totalorder %v101_v44, %v108_v48  ;;  %vm111_vm11 = vcmp.gt.s32.totalorder %v102_v43, %v107_v47  ;;  %325 = vmatprep.subr.bf16.mxu0 %v361_v45 }
 0x26a   :  { %v110_v49 = vsel %vm109_vm10, %v101_v44, %v108_v48  ;;  %v112_v50 = vsel %vm111_vm11, %v102_v43, %v107_v47  ;;  %v207_v43 = vld [vmem:[%s559_s1 + $0x8] sm:$0xff] }
 0x26b   :  { %113 = vrot.lane.b32.xlu0 %v110_v49, %s360_s14  ;;  %115 = vrot.lane.b32.xlu1 %v112_v50, %s360_s14  ;;  %v326_v44 = vpack.c.bf16 %v207_v43, %v206_v42 }
 0x2dd   :  { %v114_v51 = vpop.permute.xlu0 %113  ;;  %v116_v52 = vpop.permute.xlu1 %115 }
 0x2de   :  { %v117_v53 = vsel %vm55_vm7, %v114_v51, %v116_v52  ;;  %v118_v54 = vsel %vm55_vm7, %v116_v52, %v114_v51 }
 0x2df   :  { %vm119_vm12 = vcmp.gt.s32.totalorder %v110_v49, %v118_v54  ;;  %vm121_vm13 = vcmp.gt.s32.totalorder %v112_v50, %v117_v53 }
 0x2e0   :  { %v120_v55 = vsel %vm119_vm12, %v110_v49, %v118_v54  ;;  %v122_v56 = vsel %vm121_vm13, %v112_v50, %v117_v53 }
 0x2e1   :  { %vm123_vm14 = vcmp.gt.s32.totalorder %v120_v55, %v122_v56 }
 0x2e2   :  { %v124_v57 = vsel %vm123_vm14, %v120_v55, %v122_v56 }
 0x2e3   :  { %vm126_vm15 = vcmp.eq.s32.totalorder %v391_v7, %v124_v57  ;;  %vm125_vm0 = vcmp.eq.s32.totalorder %v385_v2, %v124_v57 }
 0x2e4   :  { %vm452_vm1 = vmand %vm100_vm8, %vm126_vm15 }
 0x2e5   :  { %v134_v59 = vsel %vm452_vm1, -1.0, %v64_v28  ;;  %vm459_vm2 = vmand %vm99_vm9, %vm125_vm0  ;;  %v130_v33 = vsel %vm452_vm1, %v417_v27, 0.0  ;;  %vm215_vm0 = vcmask 261120  }
 0x2e6   :  { %137 = vrot.lane.b32.xlu1 %v134_v59, %s359_s0  ;;  %v133_v61 = vsel %vm459_vm2, -1.0, %v63_v29  ;;  %v129_v35 = vsel %vm459_vm2, %v414_v26, 0.0  ;;  %vm327_vm1 = vmpackc.low %vm215_vm0, %vm215_vm0  ;;  %vm362_vm2 = vmmov 0  }
 0x2e7   :  { %135 = vrot.lane.b32.xlu0 %v133_v61, %s359_s0  ;;  %328 = vmatpush3.bf16.xpose.msk.msra.mxu0 %vm327_vm1, %v326_v44 }
 0x358   :  { %v138_v62 = vpop.permute.xlu1 %137 }
 0x359   :  { %v136_v63 = vpop.permute.xlu0 %135 }
 0x35a   :  { %v139_v0 = vsel %vm46_vm6, %v136_v63, %v138_v62  ;;  %v140_v1 = vsel %vm46_vm6, %v138_v62, %v136_v63 }
 0x35b   :  { %v141_v3 = vmax.f32 %v133_v61, %v140_v1  ;;  %v142_v4 = vmax.f32 %v134_v59, %v139_v0 }
 0x35d   :  { %143 = vrot.lane.b32.xlu0 %v141_v3, %s360_s14  ;;  %145 = vrot.lane.b32.xlu1 %v142_v4, %s360_s14 }
 0x3cf   :  { %v144_v5 = vpop.permute.xlu0 %143  ;;  %v146_v6 = vpop.permute.xlu1 %145 }
 0x3d0   :  { %v147_v8 = vsel %vm55_vm7, %v144_v5, %v146_v6  ;;  %v148_v9 = vsel %vm55_vm7, %v146_v6, %v144_v5  ;;  %v311_v5 = vld [vmem:[%s560_s2] ss:$0 sm:$0xff] }
 0x3d1   :  { %v149_v10 = vmax.f32 %v141_v3, %v148_v9  ;;  %v150_v11 = vmax.f32 %v142_v4, %v147_v8 }
 0x3d3   :  { %v151_v12 = vmax.f32 %v149_v10, %v150_v11 }
 0x3d5   :  { %vm153_vm3 = vcmp.eq.f32.partialorder %v134_v59, %v151_v12  ;;  %vm152_vm4 = vcmp.eq.f32.partialorder %v133_v61, %v151_v12 }
 0x3d6   :  { %v155_v13 = vsel %vm153_vm3, %v391_v7, 4294967295  ;;  %v154_v14 = vsel %vm152_vm4, %v385_v2, 4294967295 }
 0x3d7   :  { %158 = vrot.lane.b32.xlu1 %v155_v13, %s359_s0  ;;  %156 = vrot.lane.b32.xlu0 %v154_v14, %s359_s0 }
 0x449   :  { %v159_v15 = vpop.permute.xlu1 %158  ;;  %v157_v16 = vpop.permute.xlu0 %156 }
 0x44a   :  { %v160_v17 = vsel %vm46_vm6, %v157_v16, %v159_v15  ;;  %v161_v18 = vsel %vm46_vm6, %v159_v15, %v157_v16 }
 0x44b   :  { %vm162_vm5 = vcmp.gt.s32.totalorder %v154_v14, %v161_v18  ;;  %vm164_vm8 = vcmp.gt.s32.totalorder %v155_v13, %v160_v17 }
 0x44c   :  { %v163_v19 = vsel %vm162_vm5, %v154_v14, %v161_v18  ;;  %v165_v20 = vsel %vm164_vm8, %v155_v13, %v160_v17 }
 0x44d   :  { %166 = vrot.lane.b32.xlu0 %v163_v19, %s360_s14  ;;  %168 = vrot.lane.b32.xlu1 %v165_v20, %s360_s14 }
 0x451   :  { %65 = vrot.lane.b32.xlu0 %v414_v26, %s359_s0  ;;  %67 = vrot.lane.b32.xlu1 %v417_v27, %s359_s0 }
 0x4bf   :  { %v167_v21 = vpop.permute.xlu0 %166  ;;  %v169_v22 = vpop.permute.xlu1 %168 }
 0x4c0   :  { %v170_v23 = vsel %vm55_vm7, %v167_v21, %v169_v22  ;;  %v171_v24 = vsel %vm55_vm7, %v169_v22, %v167_v21 }
 0x4c1   :  { %vm172_vm9 = vcmp.gt.s32.totalorder %v163_v19, %v171_v24  ;;  %vm174_vm10 = vcmp.gt.s32.totalorder %v165_v20, %v170_v23 }
 0x4c2   :  { %v173_v28 = vsel %vm172_vm9, %v163_v19, %v171_v24  ;;  %v175_v29 = vsel %vm174_vm10, %v165_v20, %v170_v23 }
 0x4c3   :  { %vm176_vm11 = vcmp.gt.s32.totalorder %v173_v28, %v175_v29  ;;  %v66_v31 = vpop.permute.xlu0 %65  ;;  %v68_v32 = vpop.permute.xlu1 %67 }
 0x4c4   :  { %v177_v30 = vsel %vm176_vm11, %v173_v28, %v175_v29  ;;  %v69_v37 = vsel %vm46_vm6, %v66_v31, %v68_v32  ;;  %v70_v39 = vsel %vm46_vm6, %v68_v32, %v66_v31 }
 0x4c5   :  { %vm179_vm12 = vcmp.eq.s32.totalorder %v391_v7, %v177_v30  ;;  %vm178_vm13 = vcmp.eq.s32.totalorder %v385_v2, %v177_v30  ;;  %v72_v40 = vadd.f32 %v69_v37, %v417_v27  ;;  %v71_v41 = vadd.f32 %v70_v39, %v414_v26 }
 0x4c6   :  { %vm181_vm14 = vmand %vm153_vm3, %vm179_vm12 }
 0x4c7   :  { %v183_v34 = vsel %vm181_vm14, %v417_v27, 0.0  ;;  %vm180_vm15 = vmand %vm152_vm4, %vm178_vm13  ;;  %v363_v27 = vmov 0.0  }
 0x4c8   :  { %v185_v36 = vadd.f32 %v183_v34, %v130_v33  ;;  %v182_v7 = vsel %vm180_vm15, %v414_v26, 0.0  ;;  %322 = vmatprep.mubr.msk.f32.mxu0 %vm362_vm2, %v363_v27 }
 0x4c9   :  { %v184_v38 = vadd.f32 %v182_v7, %v129_v35 }
 0x4ca   :  { %188 = vrot.lane.b32.xlu1 %v185_v36, %s359_s0 }
 0x4cb   :  { %186 = vrot.lane.b32.xlu0 %v184_v38, %s359_s0 }
 0x4ce   :  { %75 = vrot.lane.b32.xlu1 %v72_v40, %s360_s14 }
 0x4cf   :  { %73 = vrot.lane.b32.xlu0 %v71_v41, %s360_s14 }
 0x53c   :  { %v189_v26 = vpop.permute.xlu1 %188 }
 0x53d   :  { %v187_v46 = vpop.permute.xlu0 %186 }
 0x53e   :  { %v190_v47 = vsel %vm46_vm6, %v187_v46, %v189_v26  ;;  %v191_v48 = vsel %vm46_vm6, %v189_v26, %v187_v46  ;;  %vm295_vm6 = vcmask 130048  }
 0x53f   :  { %v192_v49 = vadd.f32 %v191_v48, %v184_v38  ;;  %v193_v50 = vadd.f32 %v190_v47, %v185_v36 }
 0x540   :  { %v76_v51 = vpop.permute.xlu1 %75 }
 0x541   :  { %194 = vrot.lane.b32.xlu0 %v192_v49, %s360_s14  ;;  %196 = vrot.lane.b32.xlu1 %v193_v50, %s360_s14  ;;  %v74_v52 = vpop.permute.xlu0 %73 }
 0x542   :  { %v77_v53 = vsel %vm55_vm7, %v74_v52, %v76_v51  ;;  %v78_v54 = vsel %vm55_vm7, %v76_v51, %v74_v52 }
 0x543   :  { %v79_v55 = vadd.f32 %v78_v54, %v71_v41  ;;  %v80_v56 = vadd.f32 %v77_v53, %v72_v40 }
 0x545   :  { %v81_v63 = vadd.f32 %v80_v56, %v79_v55 }
 0x5b3   :  { %v197_v57 = vpop.permute.xlu1 %196  ;;  %v195_v58 = vpop.permute.xlu0 %194 }
 0x5b4   :  { %v198_v59 = vsel %vm55_vm7, %v195_v58, %v197_v57  ;;  %v199_v60 = vsel %vm55_vm7, %v197_v57, %v195_v58 }
 0x5b5   :  { %v200_v61 = vadd.f32 %v199_v60, %v192_v49  ;;  %v201_v62 = vadd.f32 %v198_v59, %v193_v50 }
 0x5b7   :  { %v202_v0 = vadd.f32 %v201_v62, %v200_v61 }
 0x5b9   :  { %v203_v1 = vsub.f32 %v81_v63, %v202_v0 }
 0x5bb   :  { %v204_v3 = vmul.f32 0.16666667, %v203_v1 }
 0x5bd   :  { %v205_v4 = vadd.f32 %v204_v3, %v411_v25 }
 0x5bf   :  { %323 = vmatmul.mubr.msk.f32.vlgmr.msra.gmra.mrb[0].mxu0 %vm215_vm0, %v205_v4 }
 0x692   :  { %v291_v6 = vpop.f32.mrb[0].mxu0 }
 0x693   :  { %v292_v2 = vadd.f32 %v311_v5, %v291_v6  ;;  %v324_v8 = vpop.f32.mrb[1].mxu0 }
 0x695   :  { %296 = vst.msk [vmem:[#allocation2] sm:$0xff] %vm295_vm6, %v292_v2 }
 0x696   :  { %346 = shalt.err (!%p343_p4)
}
 0x697   :  { %s347_s25 = scalar_lea.hbm %s561_s3, 128 }
 0x698   :  { %p348_p5 = scmp.ne.s32.totalorder %s561_s3, %s347_s25  ;;  %p351_p6 = scmp.lt.u32.totalorder %s347_s25, %s561_s3 }
 0x69a   :  { %p353_p7 = pnand %p351_p6, %p348_p5 }
 0x69c   :  { %356 = shalt.err (!%p353_p7)
}
 0x69d   :  { %306 = dma.vmem_to_hbm [thread:$0]  %s304_s21, 128, %s561_s3, [#allocation3]  }
 0x69e   :  { %357 = dma.done.wait [#allocation3], 128  }
 0x69f   :  { %358 = vsyncadd [#allocation3], 4294967168 }
 0x6a0   :  { %310 = vsyncpa [#allocation3], 1 }

</bundles_post_ra>
